<compile_context>
chip_gen: v6e
topology: v6e:2x2x1
jax: 0.10.0
libtpu: 0.0.40
codegen_flags: <defaults>
</compile_context>

<pallas_src>
import jax
import jax.numpy as jnp
from jax.experimental import pallas as pl
from jax.experimental.pallas import tpu as pltpu


def _round_up(x: int, m: int) -> int:
    return ((x + m - 1) // m) * m


def _cdiv(a: int, b: int) -> int:
    return -(-a // b)


def _mish_single_exp_f32(h):
    """Mish via the single-exp identity.

    tanh(softplus(h)) == n / (n + 2) with n = e*(e+2), e = exp(h), so only one
    transcendental (exp) plus one divide hit the EUP instead of exp+log1p+tanh.
    The h > 20 branch matches PyTorch's softplus threshold; the clamp inside
    exp prevents overflow on the non-selected branch.
    """
    e = jnp.exp(jnp.minimum(h, 20.0))
    n = e * (e + 2.0)
    r = n / (n + 2.0)
    # TODO(synk): r = n * pl.reciprocal(n + 2.0, approx=True) would shave the
    # EUP divide too, at ~1e-4 relative error (kept exact here).
    return jnp.where(h > 20.0, h, h * r)


def _time_embedding_kernel(x_ref, w1_ref, b1_ref, w2_ref, b2_ref, o_ref, h_ref):
    # Hidden activation h = mish(t * w1 + b1) is computed once per batch tile
    # (first N-tile step) into VMEM scratch and reused by every N-tile of the
    # second Linear.
    @pl.when(pl.program_id(1) == 0)
    def _():
        t = x_ref[...].astype(jnp.float32)                # (TB, 1)
        w1 = w1_ref[...].astype(jnp.float32)              # (1, Hp)
        b1 = b1_ref[...].astype(jnp.float32)              # (1, Hp)
        h = t * w1 + b1                                   # K=1 linear on the VPU
        h_ref[...] = _mish_single_exp_f32(h).astype(h_ref.dtype)

    # Linear(dim, dim) on the MXU with f32 accumulation.
    y = jnp.dot(h_ref[...], w2_ref[...], preferred_element_type=jnp.float32)
    y = y + b2_ref[...].astype(jnp.float32)               # (TB, TN)
    o_ref[...] = y.astype(o_ref.dtype)


def prepare_time_embedding_params(w1, b1, w2, b2, *, matmul_dtype=None,
                                  max_w2_block_bytes=8 * 1024 * 1024):
    """Pad (and optionally cast) the MLP parameters once, outside the hot path.

    w1: (1, dim), b1: (dim,)   -- nn.Linear(1, dim), weight stored (in, out)
    w2: (dim, dim), b2: (dim,) -- nn.Linear(dim, dim), weight stored (in, out)
    matmul_dtype: e.g. jnp.bfloat16 for the native MXU path (minor numerics change).
    """
    dim = w2.shape[1]
    mm_dtype = jnp.dtype(matmul_dtype) if matmul_dtype is not None else jnp.dtype(w2.dtype)

    # Lane-dense padded feature dims (exact: zero pad -> mish(0)=0 -> 0 contrib).
    Hp = _round_up(dim, 128)
    Op = _round_up(dim, 128)

    # N-tiling of the second Linear: cap each resident w2 column block at
    # ~max_w2_block_bytes so the footprint stays inside the 32 MiB scoped-VMEM
    # budget on every generation (v7x-safe), independent of dim.
    itemsize = mm_dtype.itemsize
    tn_cap = max(128, (max_w2_block_bytes // (Hp * itemsize)) // 128 * 128)
    n_tiles = max(1, _cdiv(Op, tn_cap))
    TN = _round_up(_cdiv(Op, n_tiles), 128)
    Op_p = n_tiles * TN

    w1p = jnp.pad(jnp.reshape(w1, (1, dim)).astype(jnp.float32), ((0, 0), (0, Hp - dim)))
    b1p = jnp.pad(jnp.reshape(b1, (1, dim)).astype(jnp.float32), ((0, 0), (0, Hp - dim)))
    w2p = jnp.pad(w2, ((0, Hp - dim), (0, Op_p - dim))).astype(mm_dtype)
    b2p = jnp.pad(jnp.reshape(b2, (1, dim)).astype(jnp.float32), ((0, 0), (0, Op_p - dim)))

    return dict(w1p=w1p, b1p=b1p, w2p=w2p, b2p=b2p,
                dim=dim, Hp=Hp, Op_p=Op_p, TN=TN, n_tiles=n_tiles)


def time_embedding_fwd(x, params, *, block_b: int = 512):
    """Forward pass. x: (B, 1) or (B,), returns (B, dim)."""
    if x.ndim == 1:
        x = x[:, None]
    B = x.shape[0]
    dim = params["dim"]
    Hp, Op_p, TN, n_tiles = params["Hp"], params["Op_p"], params["TN"], params["n_tiles"]
    w1p, b1p, w2p, b2p = params["w1p"], params["b1p"], params["w2p"], params["b2p"]
    mm_dtype = w2p.dtype

    # Batch tile: multiple of 8 sublanes; for larger batches leave >= 2 grid
    # steps so the "parallel" axis can shard across v7x's two TensorCores
    # (splitting tiny batches would just duplicate the w2 DMA per core).
    if B >= 128:
        TB = min(_round_up(_cdiv(B, 2), 8), block_b)
    else:
        TB = min(_round_up(B, 8), block_b)
    Bp = _round_up(B, TB)
    b_tiles = Bp // TB

    xp = jnp.pad(x, ((0, Bp - B), (0, 0)))

    # Constant-index-map params are single-buffered (no wasted second copy of
    # resident w2); when N-tiled, w2/b2 keep default double-buffering so their
    # DMA overlaps compute across N steps.
    resident = (n_tiles == 1)

    def _spec(shape, index_map, single_buffer):
        if single_buffer:
            return pl.BlockSpec(shape, index_map, pipeline_mode=pl.Buffered(1))
        return pl.BlockSpec(shape, index_map)

    out_itemsize = jnp.dtype(x.dtype).itemsize
    cost = pl.CostEstimate(
        flops=2 * Bp * Hp * Op_p + 4 * Bp * Hp,
        transcendentals=Bp * Hp,  # one exp per hidden element (h computed once/batch tile)
        bytes_accessed=(xp.size * xp.dtype.itemsize
                        + w1p.size * 4 + b1p.size * 4
                        + w2p.size * mm_dtype.itemsize + b2p.size * 4
                        + Bp * Op_p * out_itemsize),
    )

    out = pl.pallas_call(
        _time_embedding_kernel,
        out_shape=jax.ShapeDtypeStruct((Bp, Op_p), x.dtype),
        grid_spec=pltpu.PrefetchScalarGridSpec(
            num_scalar_prefetch=0,
            grid=(b_tiles, n_tiles),
            in_specs=[
                pl.BlockSpec((TB, 1), lambda i, j: (i, 0)),          # x  (batch-tiled)
                _spec((1, Hp), lambda i, j: (0, 0), True),           # w1 (resident, 1 buf)
                _spec((1, Hp), lambda i, j: (0, 0), True),           # b1 (resident, 1 buf)
                _spec((Hp, TN), lambda i, j: (0, j), resident),      # w2 (resident or N-tiled)
                _spec((1, TN), lambda i, j: (0, j), resident),       # b2
            ],
            out_specs=pl.BlockSpec((TB, TN), lambda i, j: (i, j)),
            scratch_shapes=[pltpu.VMEM((TB, Hp), mm_dtype)],         # mish(h), reused across N
        ),
        compiler_params=pltpu.CompilerParams(
            dimension_semantics=("parallel", "arbitrary"),
            vmem_limit_bytes=32 * 1024 * 1024,   # bounded footprint; safe on v5e/v6e/v7x
        ),
        cost_estimate=cost,
    )(xp, w1p, b1p, w2p, b2p)

    return out[:B, :dim]


def time_embedding(x, w1, b1, w2, b2, **kwargs):
    """Convenience: pad params and run (for hot loops, hoist prepare_* out)."""
    params = prepare_time_embedding_params(w1, b1, w2, b2)
    return time_embedding_fwd(x, params, **kwargs)


def _reference(x, w1, b1, w2, b2):
    # Pure-JAX reference matching PyTorch semantics (Mish with softplus thr=20).
    if x.ndim == 1:
        x = x[:, None]
    h = (x @ jnp.reshape(w1, (1, -1)) + b1).astype(jnp.float32)
    sp = jnp.where(h > 20.0, h, jnp.log1p(jnp.exp(jnp.minimum(h, 20.0))))
    h = (h * jnp.tanh(sp)).astype(x.dtype)
    return h @ w2 + b2


if __name__ == "__main__":
    B, DIM = 2, 32

    key = jax.random.PRNGKey(0)
    kx, kw1, kb1, kw2, kb2 = jax.random.split(key, 5)

    # Time values and synthetic parameters (weights stored as (in, out)).
    x = jax.random.normal(kx, (B, 1), dtype=jnp.float32)
    w1 = jax.random.normal(kw1, (1, DIM), dtype=jnp.float32) * 0.5
    b1 = jax.random.normal(kb1, (DIM,), dtype=jnp.float32) * 0.5
    w2 = jax.random.normal(kw2, (DIM, DIM), dtype=jnp.float32) * 0.1
    b2 = jax.random.normal(kb2, (DIM,), dtype=jnp.float32) * 0.1

    # Padding/casting of the weights is hoisted out of the per-call hot path.
    params = prepare_time_embedding_params(w1, b1, w2, b2)
    y = time_embedding_fwd(x, params)
    jax.block_until_ready(y)

    y_ref = _reference(x, w1, b1, w2, b2)
    assert y.shape == (B, DIM), y.shape
    assert jnp.allclose(y, y_ref, atol=1e-5, rtol=1e-5), "mismatch vs reference"

    print("KERNEL_OK")
</pallas_src>

<mosaic_0001>
module attributes {stable_mosaic.version = 11 : i64} {
  func.func @_time_embedding_kernel(%arg0: i32, %arg1: i32, %arg2: memref<8x1xf32, #tpu.memory_space<vmem>>, %arg3: memref<1x128xf32, #tpu.memory_space<vmem>>, %arg4: memref<1x128xf32, #tpu.memory_space<vmem>>, %arg5: memref<128x128xf32, #tpu.memory_space<vmem>>, %arg6: memref<1x128xf32, #tpu.memory_space<vmem>>, %arg7: memref<8x128xf32, #tpu.memory_space<vmem>>, %arg8: memref<8x128xf32, #tpu.memory_space<vmem>>) attributes {dimension_semantics = [#tpu.dimension_semantics<parallel>, #tpu.dimension_semantics<arbitrary>], iteration_bounds = array<i64: 1, 1>, scalar_prefetch = 0 : i64, scratch_operands = 1 : i64, tpu.core_type = #tpu.core_type<tc>, window_params = [{transform_indices = @transform_0, window_bounds = array<i64: 8, 1>}, {pipeline_mode = #tpu.pipeline_mode<synchronous>, transform_indices = @transform_1, window_bounds = array<i64: 1, 128>}, {pipeline_mode = #tpu.pipeline_mode<synchronous>, transform_indices = @transform_2, window_bounds = array<i64: 1, 128>}, {pipeline_mode = #tpu.pipeline_mode<synchronous>, transform_indices = @transform_3, window_bounds = array<i64: 128, 128>}, {pipeline_mode = #tpu.pipeline_mode<synchronous>, transform_indices = @transform_4, window_bounds = array<i64: 1, 128>}, {transform_indices = @transform_5, window_bounds = array<i64: 8, 128>}]} {
    %c0_i32 = arith.constant 0 : i32
    %0 = arith.cmpi eq, %arg1, %c0_i32 : i32
    %1 = arith.extui %0 : i1 to i32
    %c0_i32_0 = arith.constant 0 : i32
    %2 = arith.cmpi ne, %1, %c0_i32_0 : i32
    scf.if %2 {
      %c0_8 = arith.constant 0 : index
      %c0_9 = arith.constant 0 : index
      %10 = vector.load %arg2[%c0_8, %c0_9] : memref<8x1xf32, #tpu.memory_space<vmem>>, vector<8x1xf32>
      %c0_10 = arith.constant 0 : index
      %c0_11 = arith.constant 0 : index
      %11 = vector.load %arg3[%c0_10, %c0_11] : memref<1x128xf32, #tpu.memory_space<vmem>>, vector<1x128xf32>
      %c0_12 = arith.constant 0 : index
      %c0_13 = arith.constant 0 : index
      %12 = vector.load %arg4[%c0_12, %c0_13] : memref<1x128xf32, #tpu.memory_space<vmem>>, vector<1x128xf32>
      %13 = vector.broadcast %10 : vector<8x1xf32> to vector<8x128xf32>
      %14 = vector.broadcast %11 : vector<1x128xf32> to vector<8x128xf32>
      %15 = arith.mulf %13, %14 : vector<8x128xf32>
      %16 = vector.broadcast %12 : vector<1x128xf32> to vector<8x128xf32>
      %17 = arith.addf %15, %16 : vector<8x128xf32>
      %cst_14 = arith.constant 2.000000e+01 : f32
      %18 = vector.broadcast %cst_14 : f32 to vector<8x128xf32>
      %19 = arith.minimumf %17, %18 : vector<8x128xf32>
      %20 = math.exp %19 : vector<8x128xf32>
      %cst_15 = arith.constant 2.000000e+00 : f32
      %21 = vector.broadcast %cst_15 : f32 to vector<8x128xf32>
      %22 = arith.addf %20, %21 : vector<8x128xf32>
      %23 = arith.mulf %20, %22 : vector<8x128xf32>
      %cst_16 = arith.constant 2.000000e+00 : f32
      %24 = vector.broadcast %cst_16 : f32 to vector<8x128xf32>
      %25 = arith.addf %23, %24 : vector<8x128xf32>
      %26 = arith.divf %23, %25 : vector<8x128xf32>
      %cst_17 = arith.constant 2.000000e+01 : f32
      %27 = vector.broadcast %cst_17 : f32 to vector<8x128xf32>
      %28 = arith.cmpf ogt, %17, %27 : vector<8x128xf32>
      %29 = arith.mulf %17, %26 : vector<8x128xf32>
      %30 = arith.select %28, %17, %29 : vector<8x128xi1>, vector<8x128xf32>
      %c0_18 = arith.constant 0 : index
      %c0_19 = arith.constant 0 : index
      %31 = vector.load %arg8[%c0_18, %c0_19] : memref<8x128xf32, #tpu.memory_space<vmem>>, vector<8x128xf32>
      tpu.vector_store %arg8[%c0_18, %c0_19], %30 {strides = array<i32>} : memref<8x128xf32, #tpu.memory_space<vmem>>, vector<8x128xf32>,
    } else {
    }
    %c0 = arith.constant 0 : index
    %c0_1 = arith.constant 0 : index
    %3 = vector.load %arg8[%c0, %c0_1] : memref<8x128xf32, #tpu.memory_space<vmem>>, vector<8x128xf32>
    %c0_2 = arith.constant 0 : index
    %c0_3 = arith.constant 0 : index
    %4 = vector.load %arg5[%c0_2, %c0_3] : memref<128x128xf32, #tpu.memory_space<vmem>>, vector<128x128xf32>
    %cst = arith.constant dense<0.000000e+00> : vector<8x128xf32>
    %5 = tpu.matmul %3, %4, %cst {dimension_numbers = #tpu.dot_dimension_numbers<[1], [0], [0], [1], [0, 0, 1, 1], [], []>} : vector<8x128xf32>, vector<128x128xf32>, vector<8x128xf32> -> vector<8x128xf32>
    %c0_4 = arith.constant 0 : index
    %c0_5 = arith.constant 0 : index
    %6 = vector.load %arg6[%c0_4, %c0_5] : memref<1x128xf32, #tpu.memory_space<vmem>>, vector<1x128xf32>
    %7 = vector.broadcast %6 : vector<1x128xf32> to vector<8x128xf32>
    %8 = arith.addf %5, %7 : vector<8x128xf32>
    %c0_6 = arith.constant 0 : index
    %c0_7 = arith.constant 0 : index
    %9 = vector.load %arg7[%c0_6, %c0_7] : memref<8x128xf32, #tpu.memory_space<vmem>>, vector<8x128xf32>
    tpu.vector_store %arg7[%c0_6, %c0_7], %8 {strides = array<i32>} : memref<8x128xf32, #tpu.memory_space<vmem>>, vector<8x128xf32>,
    return
  }
  func.func @transform_0(%arg0: i32, %arg1: i32) -> (i32, i32) {
    %c0_i32 = arith.constant 0 : i32
    %c0_i32_0 = arith.constant 0 : i32
    return %arg0, %c0_i32 : i32, i32
  }
  func.func @transform_1(%arg0: i32, %arg1: i32) -> (i32, i32) {
    %c0_i32 = arith.constant 0 : i32
    %c0_i32_0 = arith.constant 0 : i32
    %c0_i32_1 = arith.constant 0 : i32
    return %c0_i32, %c0_i32_0 : i32, i32
  }
  func.func @transform_2(%arg0: i32, %arg1: i32) -> (i32, i32) {
    %c0_i32 = arith.constant 0 : i32
    %c0_i32_0 = arith.constant 0 : i32
    %c0_i32_1 = arith.constant 0 : i32
    return %c0_i32, %c0_i32_0 : i32, i32
  }
  func.func @transform_3(%arg0: i32, %arg1: i32) -> (i32, i32) {
    %c0_i32 = arith.constant 0 : i32
    %c0_i32_0 = arith.constant 0 : i32
    return %c0_i32, %arg1 : i32, i32
  }
  func.func @transform_4(%arg0: i32, %arg1: i32) -> (i32, i32) {
    %c0_i32 = arith.constant 0 : i32
    %c0_i32_0 = arith.constant 0 : i32
    return %c0_i32, %arg1 : i32, i32
  }
  func.func @transform_5(%arg0: i32, %arg1: i32) -> (i32, i32) {
    %c0_i32 = arith.constant 0 : i32
    return %arg0, %arg1 : i32, i32
  }
}

</mosaic_0001>

<bundles_post_ra>
// kernel: tpu_custom_call.1
= control target key start
LH: loop header
LB: loop body
LE: loop exit
PB: predicated region body
PF: predicated region fallthrough
CT: control target
= control target key end

     0   :  { %10 = vsyncpa [#allocation4], 0  ;;  %s349_s0 = inlined_call_operand.vmem [shape: f32[8,1], index: 0, kind: input, shape index: {}]   ;;  %s350_s1 = inlined_call_operand.vmem [shape: f32[1,128], index: 1, kind: input, shape index: {}]   ;;  %s351_s2 = inlined_call_operand.vmem [shape: f32[1,128], index: 2, kind: input, shape index: {}]   ;;  %s352_s3 = inlined_call_operand.hbm [shape: f32[128,128], index: 3, kind: input, shape index: {}]   ;;  %s353_s4 = inlined_call_operand.vmem [shape: f32[1,128], index: 4, kind: input, shape index: {}]   ;;  %s354_s5 = inlined_call_operand.hbm [shape: f32[8,128], index: 5, kind: output, shape index: {}]  }
   0x1   :  { %11 = vsyncpa [#allocation5], 0  ;;  %s294_s18 = smov [#allocation3]  }
   0x2   :  { %s23_s19 = sshll.u32 %s294_s18, 4  ;;  %s24_s19 = int_to_ptr.vmem [resolvable:$true] %s23_s19 }
   0x3   :  { %s258_s20 = scalar_lea.vmem %s24_s19, 2048  ;;  %p263_p1 = scmp.lt.s32.totalorder %s24_s19, %s24_s19 }
   0x4   :  { %p259_p0 = scmp.ne.s32.totalorder %s24_s19, %s258_s20  ;;  %p264_p2 = scmp.lt.s32.totalorder %s258_s20, %s258_s20 }
   0x6   :  { %p265_p3 = por %p264_p2, %p263_p1 }
   0x8   :  { %p266_p4 = pnand %p265_p3, %p259_p0 }
   0xa   :  { %269 = shalt.err (!%p266_p4)
}
   0xb   :  { %s295_s21 = smov 128   ;;  %s296_s22 = smov 8  }
   0xc   :  { %29 = dma.hbm_to_vmem [thread:$0]  %s352_s3, 2048, %s24_s19, [#allocation4], %s295_s21, %s295_s21, %s296_s22  }
   0xd   :  { %290 = dma.done.wait [#allocation4], 2048  }
   0xe   :  { %291 = vsyncadd [#allocation4], 4294965248  ;;  %v297_v0 = vmov 0   ;;  %v39_v1 = vld [vmem:[%s349_s0] sm:$0xff]  ;;  %v89_v2 = vld [vmem:[#allocation3 + $0x78] sm:$0xff]  ;;  %v298_v3 = vmov 0.0  }
   0xf   :  { %245 = vset.pattern.permute.xlu0 %v297_v0  ;;  %203 = vmatprep.subr.mxu0 %v298_v3  ;;  %v88_v4 = vld [vmem:[#allocation3 + $0x70] sm:$0xff]  ;;  %vm299_vm0 = vmmov 0   ;;  %v87_v5 = vld [vmem:[#allocation3 + $0x68] sm:$0xff]  ;;  %v86_v6 = vld [vmem:[#allocation3 + $0x60] sm:$0xff] }
  0x10   :  { %44 = vperm.xlu0 %245, %v39_v1   ;;  %235 = vmatprep.mubr.msk.f32.mxu0 %vm299_vm0, %v298_v3  ;;  %v85_v7 = vld [vmem:[#allocation3 + $0x58] sm:$0xff]  ;;  %v84_v8 = vld [vmem:[#allocation3 + $0x50] sm:$0xff]  ;;  %v83_v9 = vld [vmem:[#allocation3 + $0x48] sm:$0xff] }
  0x11   :  { %204 = vmatpush3.msra.mxu0 %v89_v2  ;;  %v82_v10 = vld [vmem:[#allocation3 + $0x40] sm:$0xff]  ;;  %v81_v11 = vld [vmem:[#allocation3 + $0x38] sm:$0xff]  ;;  %v80_v12 = vld [vmem:[#allocation3 + $0x30] sm:$0xff] }
  0x12   :  { %205 = vmatprep.subr.mxu0 %v298_v3  ;;  %v79_v13 = vld [vmem:[#allocation3 + $0x28] sm:$0xff]  ;;  %v78_v14 = vld [vmem:[#allocation3 + $0x20] sm:$0xff]  ;;  %v77_v15 = vld [vmem:[#allocation3 + $0x18] sm:$0xff] }
  0x13   :  { %206 = vmatpush3.msra.mxu0 %v88_v4  ;;  %v76_v16 = vld [vmem:[#allocation3 + $0x10] sm:$0xff]  ;;  %v75_v17 = vld [vmem:[#allocation3 + $0x8] sm:$0xff]  ;;  %v74_v18 = vld [vmem:[#allocation3] sm:$0xff] }
  0x14   :  { %207 = vmatprep.subr.mxu0 %v298_v3  ;;  %v183_v19 = vld [vmem:[%s350_s1] ss:$0 sm:$0xff] }
  0x15   :  { %208 = vmatpush3.msra.mxu0 %v87_v5  ;;  %v184_v20 = vld [vmem:[%s351_s2] ss:$0 sm:$0xff]  ;;  %s300_s2 = smov [#allocation6]  }
  0x16   :  { %209 = vmatprep.subr.mxu0 %v298_v3  ;;  %v185_v34 = vld [vmem:[%s353_s4] ss:$0 sm:$0xff]  ;;  %s174_s30 = sshll.u32 %s300_s2, 4  ;;  %s175_s30 = int_to_ptr.vmem [resolvable:$true] %s174_s30 }
  0x17   :  { %210 = vmatpush3.msra.mxu0 %v86_v6  ;;  %s270_s6 = scalar_lea.vmem %s175_s30, 128  ;;  %p275_p6 = scmp.lt.s32.totalorder %s175_s30, %s175_s30 }
  0x18   :  { %211 = vmatprep.subr.mxu0 %v298_v3  ;;  %p271_p5 = scmp.ne.s32.totalorder %s175_s30, %s270_s6  ;;  %p276_p7 = scmp.lt.s32.totalorder %s270_s6, %s270_s6 }
  0x19   :  { %212 = vmatpush3.msra.mxu0 %v85_v7 }
  0x1a   :  { %213 = vmatprep.subr.mxu0 %v298_v3  ;;  %p277_p8 = por %p276_p7, %p275_p6 }
  0x1b   :  { %214 = vmatpush3.msra.mxu0 %v84_v8 }
  0x1c   :  { %215 = vmatprep.subr.mxu0 %v298_v3  ;;  %p278_p9 = pnand %p277_p8, %p271_p5 }
  0x1d   :  { %216 = vmatpush3.msra.mxu0 %v83_v9 }
  0x1e   :  { %217 = vmatprep.subr.mxu0 %v298_v3 }
  0x1f   :  { %218 = vmatpush3.msra.mxu0 %v82_v10 }
  0x20   :  { %219 = vmatprep.subr.mxu0 %v298_v3 }
  0x21   :  { %220 = vmatpush3.msra.mxu0 %v81_v11 }
  0x22   :  { %221 = vmatprep.subr.mxu0 %v298_v3 }
  0x23   :  { %222 = vmatpush3.msra.mxu0 %v80_v12 }
  0x24   :  { %223 = vmatprep.subr.mxu0 %v298_v3 }
  0x25   :  { %224 = vmatpush3.msra.mxu0 %v79_v13 }
  0x26   :  { %225 = vmatprep.subr.mxu0 %v298_v3 }
  0x27   :  { %226 = vmatpush3.msra.mxu0 %v78_v14 }
  0x28   :  { %227 = vmatprep.subr.mxu0 %v298_v3 }
  0x29   :  { %228 = vmatpush3.msra.mxu0 %v77_v15 }
  0x2a   :  { %229 = vmatprep.subr.mxu0 %v298_v3 }
  0x2b   :  { %230 = vmatpush3.msra.mxu0 %v76_v16 }
  0x2c   :  { %231 = vmatprep.subr.mxu0 %v298_v3 }
  0x2d   :  { %232 = vmatpush3.msra.mxu0 %v75_v17 }
  0x2e   :  { %233 = vmatprep.subr.mxu0 %v298_v3 }
  0x2f   :  { %234 = vmatpush3.msra.mxu0 %v74_v18 }
  0x8b   :  { %v45_v21 = vpop.permute.xlu0 %44 }
  0x8c   :  { %v53_v22 = vmul.f32 %v183_v19, %v45_v21 }
  0x8e   :  { %v60_v23 = vadd.f32 %v184_v20, %v53_v22 }
  0x90   :  { %v61_v24 = vmin.f32 %v60_v23, 20.0  ;;  %vm69_vm1 = vcmp.gt.f32.partialorder %v60_v23, 20.0 }
  0x92   :  { %v62_v25 = vmul.f32 1.442695, %v61_v24 }
  0x94   :  { %246 = vpow2.f32 %v62_v25 }
  0xa1   :  { %v247_v26 = vpop.eup %246 }
  0xa2   :  { %v64_v27 = vadd.f32 2.0, %v247_v26 }
  0xa4   :  { %v65_v28 = vmul.f32 %v247_v26, %v64_v27 }
  0xa6   :  { %v66_v29 = vadd.f32 2.0, %v65_v28 }
  0xa8   :  { %248 = vrcp.f32 %v66_v29 }
  0xb5   :  { %v249_v30 = vpop.eup %248 }
  0xb6   :  { %v68_v31 = vmul.f32 %v249_v30, %v65_v28 }
  0xb8   :  { %v70_v32 = vmul.f32 %v68_v31, %v60_v23 }
  0xba   :  { %v71_v33 = vsel %vm69_vm1, %v60_v23, %v70_v32 }
  0xbb   :  { %236 = vmatmul.mubr.f32.vlgmr.msra.gmra.mxu0 %v71_v33 }
 0x17b   :  { %v163_v35 = vpop.f32.mrf.mxu0 }
 0x17c   :  { %v164_v36 = vadd.f32 %v185_v34, %v163_v35 }
 0x17d   :  { %v237_v37 = vpop.f32.mrf.mxu0 }
 0x17e   :  { %167 = vst [vmem:[#allocation6] sm:$0xff] %v164_v36 }
 0x17f   :  { %281 = shalt.err (!%p278_p9)
}
 0x180   :  { %177 = dma.vmem_to_hbm [thread:$0]  %s175_s30, 128, %s354_s5, [#allocation5]  }
 0x181   :  { %292 = dma.done.wait [#allocation5], 128  }
 0x182   :  { %293 = vsyncadd [#allocation5], 4294967168 }
 0x183   :  { %181 = vsyncpa [#allocation4], 1 }
 0x184   :  { %182 = vsyncpa [#allocation5], 1 }

</bundles_post_ra>
